<compile_context>
chip_gen: v5e
topology: v5e:2x2
jax: 0.10.0
libtpu: 0.0.40
codegen_flags: <defaults>
</compile_context>

<pallas_src>
import functools

import jax
import jax.numpy as jnp
import numpy as np
from jax.experimental import pallas as pl
from jax.experimental.pallas import tpu as pltpu

SMOOTHING = 0.1


def _ls_ce_kernel(x_ref, tgt_ref, o_ref, m_ref, s_ref, xt_ref, xs_ref, *,
                  n_total, n_classes, tile_n, tile_c, confidence, smoothing,
                  mask_lanes, mask_rows):
    i = pl.program_id(0)   # row tile (parallel -> megacore-shardable)
    j = pl.program_id(1)   # class chunk (arbitrary, innermost)

    @pl.when(j == 0)
    def _init():
        m_ref[...] = jnp.full_like(m_ref, -jnp.inf)
        s_ref[...] = jnp.zeros_like(s_ref)
        xt_ref[...] = jnp.zeros_like(xt_ref)
        xs_ref[...] = jnp.zeros_like(xs_ref)

    x = x_ref[...].astype(jnp.float32)            # (tile_n, tile_c)
    tgt = tgt_ref[...]                            # (tile_n, 1) int32

    # Global class ids for this chunk as a (1, tile_c) row; sublane broadcast
    # handles the rows in the compares below (no (tile_n, tile_c) iota).
    cls_ids = j * tile_c + jax.lax.broadcasted_iota(jnp.int32, (1, tile_c), 1)

    if mask_lanes:
        # Last class chunk is ragged (C % tile_c != 0): mask the lane tail.
        lane_ok = cls_ids < n_classes             # (1, tile_c)
        x_for_max = jnp.where(lane_ok, x, -jnp.inf)
        x_for_sum = jnp.where(lane_ok, x, 0.0)
    else:
        x_for_max = x
        x_for_sum = x

    # --- Online log-sum-exp over class chunks (running max / running sumexp).
    chunk_max = jnp.max(x_for_max, axis=-1, keepdims=True)          # (tile_n, 1)
    m_new = jnp.maximum(m_ref[...], chunk_max)
    s_ref[...] = (s_ref[...] * jnp.exp(m_ref[...] - m_new)
                  + jnp.sum(jnp.exp(x_for_max - m_new), axis=-1, keepdims=True))
    m_ref[...] = m_new

    # Running x[row, target[row]] (one-hot masked sum; the target lands in
    # exactly one chunk) and running sum(x) for the smoothing term.
    xt_ref[...] += jnp.sum(jnp.where(cls_ids == tgt, x, 0.0),
                           axis=-1, keepdims=True)
    xs_ref[...] += jnp.sum(x_for_sum, axis=-1, keepdims=True)

    @pl.when(j == pl.num_programs(1) - 1)
    def _finalize():
        lse = m_ref[...] + jnp.log(s_ref[...])                      # (tile_n, 1)
        x_mean = xs_ref[...] * (1.0 / n_classes)
        # confidence*(lse - x_t) + smoothing*(lse - mean(x)), folded.
        loss = lse - confidence * xt_ref[...] - smoothing * x_mean  # (tile_n, 1)
        if mask_rows:
            # Last row tile may cover rows beyond N (ragged batch) -> zero them
            # (defensive; the partial-block writeback is clipped anyway).
            row_ids = i * tile_n + jax.lax.broadcasted_iota(jnp.int32,
                                                            loss.shape, 0)
            loss = jnp.where(row_ids < n_total, loss, 0.0)
        o_ref[...] = loss


def label_smoothing_cross_entropy(x, target, *, smoothing=SMOOTHING,
                                  tile_n=None, tile_c=None):
    """x: (N, C) float logits (f32 or bf16), target: (N,) int labels -> scalar f32."""
    assert smoothing < 1.0
    n, c = x.shape
    itemsize = x.dtype.itemsize

    # ---- class-chunk width ------------------------------------------------
    if tile_c is None:
        tile_c = c if c <= 4096 else 2048   # chunk vocab-scale C (online LSE)
    tile_c = int(tile_c)
    if tile_c >= c:
        tile_c = c                          # single full-extent chunk
    else:
        tile_c = max(128, (tile_c // 128) * 128)   # <C chunks must be lane-tiled
    num_c = -(-c // tile_c)

    # ---- row-tile height: pure byte budget (no arbitrary row cap) ----------
    # Budget counts the double-buffered x block, f32 elementwise temporaries
    # and the lane-padded (tile_n, 1) column scratch; ~32 MiB working set is
    # safe within v7x's 64 MiB VMEM and leaves slack on v5e/v6e.
    if tile_n is None:
        budget = 32 * 1024 * 1024
        per_row = (2 * tile_c * itemsize      # double-buffered x block
                   + 3 * tile_c * 4           # f32 temporaries (upcast/exp/select)
                   + 8 * 128 * 4)             # lane-padded column vectors
        rows = max(8, budget // per_row)
        tile_n = (rows // 8) * 8
    tile_n = int(tile_n)
    if tile_n >= n:
        tile_n = n                            # single full-extent row block
    else:
        tile_n = max(8, (tile_n // 8) * 8)
    num_n = -(-n // tile_n)

    mask_lanes = (num_c > 1) and (c % tile_c != 0)
    mask_rows = (n % tile_n) != 0

    target2d = target.astype(jnp.int32).reshape(n, 1)

    # VMEM limit from the actual footprint (+ headroom), clamped for v7x.
    x_block = tile_n * tile_c * itemsize
    footprint = (2 * x_block                  # double-buffered input
                 + 3 * tile_n * tile_c * 4    # f32 temporaries
                 + 10 * tile_n * 128 * 4      # scratch + column temps (padded)
                 + (4 << 20))                 # margin
    vmem_limit = int(min(max(footprint, 16 << 20), 48 << 20))

    kernel = functools.partial(
        _ls_ce_kernel,
        n_total=int(n),
        n_classes=int(c),
        tile_n=int(tile_n),
        tile_c=int(tile_c),
        confidence=float(1.0 - smoothing),
        smoothing=float(smoothing),
        mask_lanes=bool(mask_lanes),
        mask_rows=bool(mask_rows),
    )

    per_row = pl.pallas_call(
        kernel,
        out_shape=jax.ShapeDtypeStruct((n, 1), jnp.float32),
        grid_spec=pltpu.PrefetchScalarGridSpec(
            num_scalar_prefetch=0,
            grid=(num_n, num_c),
            in_specs=[
                pl.BlockSpec((tile_n, tile_c), lambda i, j: (i, j)),
                pl.BlockSpec((tile_n, 1), lambda i, j: (i, 0)),
            ],
            out_specs=pl.BlockSpec((tile_n, 1), lambda i, j: (i, 0)),
            scratch_shapes=[
                pltpu.VMEM((tile_n, 1), jnp.float32),   # running max
                pltpu.VMEM((tile_n, 1), jnp.float32),   # running sum-exp
                pltpu.VMEM((tile_n, 1), jnp.float32),   # running x[target]
                pltpu.VMEM((tile_n, 1), jnp.float32),   # running sum(x)
            ],
        ),
        compiler_params=pltpu.CompilerParams(
            dimension_semantics=("parallel", "arbitrary"),
            vmem_limit_bytes=vmem_limit,
        ),
    )(x, target2d)

    # Final mean over rows happens outside the kernel (trivial XLA reduce);
    # keeping per-tile outputs independent is what lets the row axis be
    # "parallel" (megacore) instead of a single-TC accumulator.
    return jnp.mean(per_row)


def _reference(x, target, smoothing=SMOOTHING):
    x = x.astype(jnp.float32)
    logp = jax.nn.log_softmax(x, axis=-1)
    nll = -jnp.take_along_axis(logp, target[:, None].astype(jnp.int32), axis=-1)[:, 0]
    smooth = -jnp.mean(logp, axis=-1)
    return jnp.mean((1.0 - smoothing) * nll + smoothing * smooth)


if __name__ == "__main__":
    key = jax.random.PRNGKey(0)
    ks = jax.random.split(key, 8)

    # Case 1: ragged batch, non-128-multiple class count, forced multi-row-tile grid.
    N1, C1 = 50, 100
    x1 = jax.random.normal(ks[0], (N1, C1), dtype=jnp.float32)
    t1 = jax.random.randint(ks[1], (N1,), 0, C1, dtype=jnp.int32)
    loss1 = jax.block_until_ready(label_smoothing_cross_entropy(x1, t1, tile_n=16))
    ref1 = jax.block_until_ready(_reference(x1, t1))
    assert np.allclose(np.asarray(loss1), np.asarray(ref1), rtol=1e-5, atol=1e-5), (
        loss1, ref1)

    # Case 2: forced class chunking (online LSE path) with a ragged last chunk.
    N2, C2 = 24, 300
    x2 = jax.random.normal(ks[2], (N2, C2), dtype=jnp.float32)
    t2 = jax.random.randint(ks[3], (N2,), 0, C2, dtype=jnp.int32)
    loss2 = jax.block_until_ready(
        label_smoothing_cross_entropy(x2, t2, tile_n=8, tile_c=128))
    ref2 = jax.block_until_ready(_reference(x2, t2))
    assert np.allclose(np.asarray(loss2), np.asarray(ref2), rtol=1e-5, atol=1e-5), (
        loss2, ref2)

    # Case 3: clean shapes, automatic tile selection (f32).
    N3, C3 = 32, 128
    x3 = jax.random.normal(ks[4], (N3, C3), dtype=jnp.float32)
    t3 = jax.random.randint(ks[5], (N3,), 0, C3, dtype=jnp.int32)
    loss3 = jax.block_until_ready(label_smoothing_cross_entropy(x3, t3))
    ref3 = jax.block_until_ready(_reference(x3, t3))
    assert np.allclose(np.asarray(loss3), np.asarray(ref3), rtol=1e-5, atol=1e-5), (
        loss3, ref3)

    # Case 4: bf16 logits end-to-end (halves HBM bytes; upcast inside kernel).
    x4 = x3.astype(jnp.bfloat16)
    loss4 = jax.block_until_ready(label_smoothing_cross_entropy(x4, t3))
    ref4 = jax.block_until_ready(_reference(x4.astype(jnp.float32), t3))
    assert np.allclose(np.asarray(loss4), np.asarray(ref4), rtol=2e-2, atol=2e-2), (
        loss4, ref4)

    print("KERNEL_OK")
</pallas_src>

<mosaic_0001>
module attributes {stable_mosaic.version = 11 : i64} {
  func.func @_ls_ce_kernel(%arg0: i32, %arg1: i32, %arg2: memref<16x100xf32, #tpu.memory_space<vmem>>, %arg3: memref<16x1xi32, #tpu.memory_space<vmem>>, %arg4: memref<16x1xf32, #tpu.memory_space<vmem>>, %arg5: memref<16x1xf32, #tpu.memory_space<vmem>>, %arg6: memref<16x1xf32, #tpu.memory_space<vmem>>, %arg7: memref<16x1xf32, #tpu.memory_space<vmem>>, %arg8: memref<16x1xf32, #tpu.memory_space<vmem>>) attributes {dimension_semantics = [#tpu.dimension_semantics<parallel>, #tpu.dimension_semantics<arbitrary>], iteration_bounds = array<i64: 4, 1>, scalar_prefetch = 0 : i64, scratch_operands = 4 : i64, tpu.core_type = #tpu.core_type<tc>, window_params = [{transform_indices = @transform_0, window_bounds = array<i64: 16, 100>}, {transform_indices = @transform_1, window_bounds = array<i64: 16, 1>}, {transform_indices = @transform_2, window_bounds = array<i64: 16, 1>}]} {
    %c0_i32 = arith.constant 0 : i32
    %0 = arith.cmpi eq, %arg1, %c0_i32 : i32
    %1 = arith.extui %0 : i1 to i32
    %c0_i32_0 = arith.constant 0 : i32
    %2 = arith.cmpi ne, %1, %c0_i32_0 : i32
    scf.if %2 {
      %cst_28 = arith.constant 0xFF800000 : f32
      %44 = vector.broadcast %cst_28 : f32 to vector<16x1xf32>
      %c0_29 = arith.constant 0 : index
      %c0_30 = arith.constant 0 : index
      %45 = vector.load %arg5[%c0_29, %c0_30] : memref<16x1xf32, #tpu.memory_space<vmem>>, vector<16x1xf32>
      tpu.vector_store %arg5[%c0_29, %c0_30], %44 {strides = array<i32>} : memref<16x1xf32, #tpu.memory_space<vmem>>, vector<16x1xf32>,
      %cst_31 = arith.constant 0.000000e+00 : f32
      %46 = vector.broadcast %cst_31 : f32 to vector<16x1xf32>
      %c0_32 = arith.constant 0 : index
      %c0_33 = arith.constant 0 : index
      %47 = vector.load %arg6[%c0_32, %c0_33] : memref<16x1xf32, #tpu.memory_space<vmem>>, vector<16x1xf32>
      tpu.vector_store %arg6[%c0_32, %c0_33], %46 {strides = array<i32>} : memref<16x1xf32, #tpu.memory_space<vmem>>, vector<16x1xf32>,
      %cst_34 = arith.constant 0.000000e+00 : f32
      %48 = vector.broadcast %cst_34 : f32 to vector<16x1xf32>
      %c0_35 = arith.constant 0 : index
      %c0_36 = arith.constant 0 : index
      %49 = vector.load %arg7[%c0_35, %c0_36] : memref<16x1xf32, #tpu.memory_space<vmem>>, vector<16x1xf32>
      tpu.vector_store %arg7[%c0_35, %c0_36], %48 {strides = array<i32>} : memref<16x1xf32, #tpu.memory_space<vmem>>, vector<16x1xf32>,
      %cst_37 = arith.constant 0.000000e+00 : f32
      %50 = vector.broadcast %cst_37 : f32 to vector<16x1xf32>
      %c0_38 = arith.constant 0 : index
      %c0_39 = arith.constant 0 : index
      %51 = vector.load %arg8[%c0_38, %c0_39] : memref<16x1xf32, #tpu.memory_space<vmem>>, vector<16x1xf32>
      tpu.vector_store %arg8[%c0_38, %c0_39], %50 {strides = array<i32>} : memref<16x1xf32, #tpu.memory_space<vmem>>, vector<16x1xf32>,
    } else {
    }
    %c0 = arith.constant 0 : index
    %c0_1 = arith.constant 0 : index
    %3 = vector.load %arg2[%c0, %c0_1] : memref<16x100xf32, #tpu.memory_space<vmem>>, vector<16x100xf32>
    %c0_2 = arith.constant 0 : index
    %c0_3 = arith.constant 0 : index
    %4 = vector.load %arg3[%c0_2, %c0_3] : memref<16x1xi32, #tpu.memory_space<vmem>>, vector<16x1xi32>
    %c100_i32 = arith.constant 100 : i32
    %5 = arith.muli %arg1, %c100_i32 : i32
    %6 = tpu.iota {dimensions = array<i32: 1>} : vector<1x100xi32>
    %7 = vector.broadcast %5 : i32 to vector<1x100xi32>
    %8 = arith.addi %7, %6 : vector<1x100xi32>
    %cst = arith.constant dense<0xFF800000> : vector<16xf32>
    %9 = vector.multi_reduction <maximumf>, %3, %cst [1] : vector<16x100xf32> to vector<16xf32>
    %10 = vector.shape_cast %9 : vector<16xf32> to vector<16x1xf32>
    %c0_4 = arith.constant 0 : index
    %c0_5 = arith.constant 0 : index
    %11 = vector.load %arg5[%c0_4, %c0_5] : memref<16x1xf32, #tpu.memory_space<vmem>>, vector<16x1xf32>
    %12 = arith.maximumf %11, %10 : vector<16x1xf32>
    %c0_6 = arith.constant 0 : index
    %c0_7 = arith.constant 0 : index
    %13 = vector.load %arg6[%c0_6, %c0_7] : memref<16x1xf32, #tpu.memory_space<vmem>>, vector<16x1xf32>
    %c0_8 = arith.constant 0 : index
    %c0_9 = arith.constant 0 : index
    %14 = vector.load %arg5[%c0_8, %c0_9] : memref<16x1xf32, #tpu.memory_space<vmem>>, vector<16x1xf32>
    %15 = arith.subf %14, %12 : vector<16x1xf32>
    %16 = math.exp %15 : vector<16x1xf32>
    %17 = arith.mulf %13, %16 : vector<16x1xf32>
    %18 = vector.broadcast %12 : vector<16x1xf32> to vector<16x100xf32>
    %19 = arith.subf %3, %18 : vector<16x100xf32>
    %20 = math.exp %19 : vector<16x100xf32>
    %cst_10 = arith.constant dense<0.000000e+00> : vector<16xf32>
    %21 = vector.multi_reduction <add>, %20, %cst_10 [1] : vector<16x100xf32> to vector<16xf32>
    %22 = vector.shape_cast %21 : vector<16xf32> to vector<16x1xf32>
    %23 = arith.addf %17, %22 : vector<16x1xf32>
    %c0_11 = arith.constant 0 : index
    %c0_12 = arith.constant 0 : index
    %24 = vector.load %arg6[%c0_11, %c0_12] : memref<16x1xf32, #tpu.memory_space<vmem>>, vector<16x1xf32>
    tpu.vector_store %arg6[%c0_11, %c0_12], %23 {strides = array<i32>} : memref<16x1xf32, #tpu.memory_space<vmem>>, vector<16x1xf32>,
    %c0_13 = arith.constant 0 : index
    %c0_14 = arith.constant 0 : index
    %25 = vector.load %arg5[%c0_13, %c0_14] : memref<16x1xf32, #tpu.memory_space<vmem>>, vector<16x1xf32>
    tpu.vector_store %arg5[%c0_13, %c0_14], %12 {strides = array<i32>} : memref<16x1xf32, #tpu.memory_space<vmem>>, vector<16x1xf32>,
    %c0_15 = arith.constant 0 : index
    %c0_16 = arith.constant 0 : index
    %26 = vector.load %arg7[%c0_15, %c0_16] : memref<16x1xf32, #tpu.memory_space<vmem>>, vector<16x1xf32>
    %27 = vector.broadcast %8 : vector<1x100xi32> to vector<16x100xi32>
    %28 = vector.broadcast %4 : vector<16x1xi32> to vector<16x100xi32>
    %29 = arith.cmpi eq, %27, %28 : vector<16x100xi32>
    %cst_17 = arith.constant 0.000000e+00 : f32
    %30 = vector.broadcast %cst_17 : f32 to vector<16x100xf32>
    %31 = arith.select %29, %3, %30 : vector<16x100xi1>, vector<16x100xf32>
    %cst_18 = arith.constant dense<0.000000e+00> : vector<16xf32>
    %32 = vector.multi_reduction <add>, %31, %cst_18 [1] : vector<16x100xf32> to vector<16xf32>
    %33 = vector.shape_cast %32 : vector<16xf32> to vector<16x1xf32>
    %34 = arith.addf %26, %33 : vector<16x1xf32>
    %c0_19 = arith.constant 0 : index
    %c0_20 = arith.constant 0 : index
    %35 = vector.load %arg7[%c0_19, %c0_20] : memref<16x1xf32, #tpu.memory_space<vmem>>, vector<16x1xf32>
    tpu.vector_store %arg7[%c0_19, %c0_20], %34 {strides = array<i32>} : memref<16x1xf32, #tpu.memory_space<vmem>>, vector<16x1xf32>,
    %c0_21 = arith.constant 0 : index
    %c0_22 = arith.constant 0 : index
    %36 = vector.load %arg8[%c0_21, %c0_22] : memref<16x1xf32, #tpu.memory_space<vmem>>, vector<16x1xf32>
    %cst_23 = arith.constant dense<0.000000e+00> : vector<16xf32>
    %37 = vector.multi_reduction <add>, %3, %cst_23 [1] : vector<16x100xf32> to vector<16xf32>
    %38 = vector.shape_cast %37 : vector<16xf32> to vector<16x1xf32>
    %39 = arith.addf %36, %38 : vector<16x1xf32>
    %c0_24 = arith.constant 0 : index
    %c0_25 = arith.constant 0 : index
    %40 = vector.load %arg8[%c0_24, %c0_25] : memref<16x1xf32, #tpu.memory_space<vmem>>, vector<16x1xf32>
    tpu.vector_store %arg8[%c0_24, %c0_25], %39 {strides = array<i32>} : memref<16x1xf32, #tpu.memory_space<vmem>>, vector<16x1xf32>,
    %c0_i32_26 = arith.constant 0 : i32
    %41 = arith.cmpi eq, %arg1, %c0_i32_26 : i32
    %42 = arith.extui %41 : i1 to i32
    %c0_i32_27 = arith.constant 0 : i32
    %43 = arith.cmpi ne, %42, %c0_i32_27 : i32
    scf.if %43 {
      %c0_28 = arith.constant 0 : index
      %c0_29 = arith.constant 0 : index
      %44 = vector.load %arg5[%c0_28, %c0_29] : memref<16x1xf32, #tpu.memory_space<vmem>>, vector<16x1xf32>
      %c0_30 = arith.constant 0 : index
      %c0_31 = arith.constant 0 : index
      %45 = vector.load %arg6[%c0_30, %c0_31] : memref<16x1xf32, #tpu.memory_space<vmem>>, vector<16x1xf32>
      %46 = math.log %45 : vector<16x1xf32>
      %47 = arith.addf %44, %46 : vector<16x1xf32>
      %c0_32 = arith.constant 0 : index
      %c0_33 = arith.constant 0 : index
      %48 = vector.load %arg8[%c0_32, %c0_33] : memref<16x1xf32, #tpu.memory_space<vmem>>, vector<16x1xf32>
      %cst_34 = arith.constant 0.00999999977 : f32
      %49 = vector.broadcast %cst_34 : f32 to vector<16x1xf32>
      %50 = arith.mulf %48, %49 : vector<16x1xf32>
      %c0_35 = arith.constant 0 : index
      %c0_36 = arith.constant 0 : index
      %51 = vector.load %arg7[%c0_35, %c0_36] : memref<16x1xf32, #tpu.memory_space<vmem>>, vector<16x1xf32>
      %cst_37 = arith.constant 0.899999976 : f32
      %52 = vector.broadcast %cst_37 : f32 to vector<16x1xf32>
      %53 = arith.mulf %52, %51 : vector<16x1xf32>
      %54 = arith.subf %47, %53 : vector<16x1xf32>
      %cst_38 = arith.constant 1.000000e-01 : f32
      %55 = vector.broadcast %cst_38 : f32 to vector<16x1xf32>
      %56 = arith.mulf %55, %50 : vector<16x1xf32>
      %57 = arith.subf %54, %56 : vector<16x1xf32>
      %c16_i32 = arith.constant 16 : i32
      %58 = arith.muli %arg0, %c16_i32 : i32
      %59 = tpu.iota {dimensions = array<i32: 0>} : vector<16x1xi32>
      %60 = vector.broadcast %58 : i32 to vector<16x1xi32>
      %61 = arith.addi %60, %59 : vector<16x1xi32>
      %c50_i32 = arith.constant 50 : i32
      %62 = vector.broadcast %c50_i32 : i32 to vector<16x1xi32>
      %63 = arith.cmpi slt, %61, %62 : vector<16x1xi32>
      %cst_39 = arith.constant 0.000000e+00 : f32
      %64 = vector.broadcast %cst_39 : f32 to vector<16x1xf32>
      %65 = arith.select %63, %57, %64 : vector<16x1xi1>, vector<16x1xf32>
      %c0_40 = arith.constant 0 : index
      %c0_41 = arith.constant 0 : index
      %66 = vector.load %arg4[%c0_40, %c0_41] : memref<16x1xf32, #tpu.memory_space<vmem>>, vector<16x1xf32>
      tpu.vector_store %arg4[%c0_40, %c0_41], %65 {strides = array<i32>} : memref<16x1xf32, #tpu.memory_space<vmem>>, vector<16x1xf32>,
    } else {
    }
    return
  }
  func.func @transform_0(%arg0: i32, %arg1: i32) -> (i32, i32) {
    %c0_i32 = arith.constant 0 : i32
    return %arg0, %arg1 : i32, i32
  }
  func.func @transform_1(%arg0: i32, %arg1: i32) -> (i32, i32) {
    %c0_i32 = arith.constant 0 : i32
    %c0_i32_0 = arith.constant 0 : i32
    return %arg0, %c0_i32 : i32, i32
  }
  func.func @transform_2(%arg0: i32, %arg1: i32) -> (i32, i32) {
    %c0_i32 = arith.constant 0 : i32
    %c0_i32_0 = arith.constant 0 : i32
    return %arg0, %c0_i32 : i32, i32
  }
}

</mosaic_0001>

<bundles_post_ra>
// kernel: tpu_custom_call.1
= control target key start
LH: loop header
LB: loop body
LE: loop exit
PB: predicated region body
PF: predicated region fallthrough
CT: control target
= control target key end

     0   :  { %s894_s9 = smov 0   ;;  %s896_s10 = smov 0   ;;  %s1031_s0 = inlined_call_operand.vmem [shape: f32[50,100], index: 0, kind: input, shape index: {}]   ;;  %s1032_s1 = inlined_call_operand.vmem [shape: s32[50,1], index: 1, kind: input, shape index: {}]   ;;  %s1033_s2 = inlined_call_operand.vmem [shape: f32[50,1], index: 2, kind: output, shape index: {}]  }
   0x1   :  { %s898_s11 = smov 0   ;;  %s900_s12 = smov 0  }
   0x2   :  { %s902_s13 = smov 0  }
   0x3 LB: > { %s619_s14 = sadd.s32 4294967295, %s842_s13   ;;  %s24_s15 = sadd.s32 1, %s838_s12  ;;  %s842_s13 = sphi %s902_s13, %s12_s13   ;;  %s838_s12 = sphi %s900_s12, %s1038_s12   ;;  %s834_s11 = sphi %s898_s11, %s1037_s11   ;;  %s830_s10 = sphi %s896_s10, %s1036_s10   ;;  %s826_s9 = sphi %s894_s9, %s1035_s9  }
   0x4   : > { %p26_p0 = scmp.ge.s32.totalorder %s24_s15, 4  ;;  %s85_s16 = sadd.s32 1, %s830_s10 }
   0x5   : > { %p95_p1 = scmp.ne.s32.totalorder %s830_s10, %s826_s9  ;;  %p96_p2 = scmp.eq.s32.totalorder %s619_s14, 3 }
   0x6   : > { %s1040_s15 = smov (%p26_p0, %s24_s15), 0  ;;  %p623_p4 = scmp.ge.s32.totalorder %s842_s13, 1 }
   0x7   : > { %p926_p3 = por %p96_p2, %p95_p1  ;;  %s82_s18 = ssub.s32 %s838_s12, %s1040_s15 }
   0x8   : > { %p157_p5 = scmp.lt.s32.totalorder %s842_s13, 5  ;;  %p83_p6 = scmp.eq.s32.totalorder %s82_s18, 0 }
   0xa   : > { %p158_p7 = pnand %p623_p4, %p157_p5 }
   0xb   : > { %s935_s19 = scalar_select %p83_p6, %s830_s10, %s85_s16  }
   0xc   : > { %161 = sbr.rel (%p158_p7) target bundleno = 465 (0x1d1), region = 28  ;;  %s938_s20 = sshll.u32 (!%p158_p7), %s834_s11, 1 }
   0xd   : > { %p199_p8 = scmp.lt.s32.totalorder (!%p158_p7), %s938_s20, 6  ;;  %s629_s29 = sshll.u32 (!%p158_p7), %s834_s11, 4 }
   0xe   : > { %s191_s30 = sand.u32 (!%p158_p7), 1, %s826_s9  }
   0xf   : > { %s624_s3 = sshll.u32 (!%p158_p7), %s191_s30, 4 }
  0x10   : > { %s978_s4 = scalar_lea.vmem (!%p158_p7), [#allocation6], %s624_s3  }
  0x11   : > { %vm234_vm0 = vcmask 7168   ;;  %v876_v0 = vmov -inf   ;;  %s200_s21 = scalar_select %p199_p8, %s938_s20, 6  ;;  %vm252_vm1 = vcmask 818176   ;;  %v877_v5 = vmov 0  }
  0x12   : > { %235 = vst.msk [vmem:[#allocation2] sm:$0xff] %vm234_vm0, %v876_v0  ;;  %757 = vset.pattern.permute.xlu1 %v877_v5  ;;  %758 = vset.pattern.permute.xlu2 %v877_v5  ;;  %v878_v6 = vmov 0.0   ;;  %v248_v17 = vlaneseq  ;;  %s384_s5 = ssub.s32 (%p926_p3), 7, %s938_s20  ;;  %s992_s8 = scalar_lea.vmem (%p926_p3), %s1033_s2, %s629_s29  }
  0x13   : > { %236 = vst.msk [vmem:[#allocation2 + $0x8] sm:$0xff] %vm234_vm0, %v876_v0  ;;  %s626_s22 = sshll.u32 %s200_s21, 3  ;;  %759 = vset.pattern.permute.xlu0 %v877_v5  ;;  %v367_v0 = vstv %s629_s29  ;;  %p385_p9 = scmp.lt.s32.totalorder (%p926_p3), %s384_s5, 2 }
  0x14   : > { %s205_s25 = scalar_lea.vmem %s1031_s0, %s626_s22  ;;  %239 = vst.msk [vmem:[#allocation4] sm:$0xff] %vm234_vm0, %v878_v6  ;;  %s219_s28 = scalar_lea.vmem %s1032_s1, %s626_s22  ;;  %v249_v18 = vand.u32 127, %v248_v17  ;;  %v365_v62 = vshrl.u32 %v248_v17, 7 }
  0x15   : > { %v243_v1 = vld [vmem:[%s205_s25] sm:$0xff]  ;;  %v244_v3 = vld [vmem:[%s205_s25 + $0x8] sm:$0xff]  ;;  %237 = vst.msk [vmem:[#allocation3] sm:$0xff] %vm234_vm0, %v878_v6 }
  0x16   : > { %v253_v2 = vsel %vm252_vm1, %v243_v1, -inf  ;;  %v256_v4 = vsel %vm252_vm1, %v244_v3, -inf  ;;  %238 = vst.msk [vmem:[#allocation3 + $0x8] sm:$0xff] %vm234_vm0, %v878_v6  ;;  %v245_v7 = vld [vmem:[%s219_s28] sm:$0xff]  ;;  %v246_v8 = vld [vmem:[%s219_s28 + $0x8] sm:$0xff]  ;;  %v326_v35 = vsel %vm252_vm1, %v243_v1, 0.0 }
  0x17   : > { %254 = vmax.xlane.f32.xlu0 %v253_v2  ;;  %240 = vst.msk [vmem:[#allocation4 + $0x8] sm:$0xff] %vm234_vm0, %v878_v6  ;;  %305 = vperm.xlu2 %758, %v245_v7   ;;  %v329_v36 = vsel %vm252_vm1, %v244_v3, 0.0  ;;  %v368_v7 = vadd.s32 %v367_v0, %v365_v62 }
  0x18   : > { %241 = vst.msk [vmem:[#allocation5] sm:$0xff] %vm234_vm0, %v878_v6 }
  0x19   : > { %242 = vst.msk [vmem:[#allocation5 + $0x8] sm:$0xff] %vm234_vm0, %v878_v6  ;;  %v259_v9 = vld [vmem:[#allocation2] sm:$0xff]  ;;  %vm370_vm4 = vcmp.lt.s32.totalorder %v368_v7, 50 }
  0x1a   : > { %v260_v13 = vld [vmem:[#allocation2 + $0x8] sm:$0xff] }
  0x1b   : > { %v302_v37 = vld [vmem:[#allocation4] sm:$0xff] }
  0x1c   : > { %v263_v43 = vld [vmem:[#allocation3] sm:$0xff] }
  0x1d   : > { %v264_v48 = vld [vmem:[#allocation3 + $0x8] sm:$0xff] }
  0x1e   : > { %v303_v49 = vld [vmem:[#allocation4 + $0x8] sm:$0xff] }
  0x1f   : > { %257 = vmax.xlane.f32.xlu0 %v256_v4  ;;  %308 = vperm.xlu2 %758, %v246_v8   ;;  %v324_v56 = vld [vmem:[#allocation5] sm:$0xff] }
  0x20   : > { %v325_v63 = vld [vmem:[#allocation5 + $0x8] sm:$0xff] }
  0x71   : > { %v306_v19 = vpop.permute.xlu2 %305 }
  0x72   : > { %vm310_vm2 = vcmp.eq.s32.totalorder %v249_v18, %v306_v19 }
  0x73   : > { %v312_v20 = vsel %vm310_vm2, %v243_v1, 0.0 }
  0x74   : > { %v314_v21 = vsel %vm252_vm1, %v312_v20, 0.0 }
  0x75   : > { %315 = vadd.xlane.f32.xlu2 %v314_v21 }
  0x79   : > { %v309_v29 = vpop.permute.xlu2 %308 }
  0x7a   : > { %vm311_vm3 = vcmp.eq.s32.totalorder %v249_v18, %v309_v29 }
  0x7b   : > { %v313_v31 = vsel %vm311_vm3, %v244_v3, 0.0 }
  0x7c   : > { %v317_v33 = vsel %vm252_vm1, %v313_v31, 0.0 }
  0x8a   : > { %v255_v10 = vpop.xlane.xlu0 %254 }
  0x8b   : > { %v261_v11 = vmax.f32 %v259_v9, %v255_v10 }
  0x8d   : > { %v265_v12 = vsub.f32 %v259_v9, %v261_v11  ;;  %300 = vst.msk [vmem:[#allocation2] sm:$0xff] %vm234_vm0, %v261_v11  ;;  %275 = vperm.xlu1 %757, %v261_v11  }
  0x8f   : > { %v267_v40 = vmul.f32 1.442695, %v265_v12 }
  0x92   : > { %v258_v14 = vpop.xlane.xlu0 %257 }
  0x93   : > { %v262_v15 = vmax.f32 %v260_v13, %v258_v14  ;;  %v366_v14 = vadd.s32 8, %v365_v62 }
  0x95   : > { %v266_v16 = vsub.f32 %v260_v13, %v262_v15  ;;  %301 = vst.msk [vmem:[#allocation2 + $0x8] sm:$0xff] %vm234_vm0, %v262_v15  ;;  %280 = vperm.xlu1 %757, %v262_v15   ;;  %v369_v20 = vadd.s32 %v367_v0, %v366_v14 }
  0x97   : > { %v269_v41 = vmul.f32 1.442695, %v266_v16  ;;  %vm371_vm5 = vcmp.lt.s32.totalorder %v369_v20, 50 }
  0x9c   : > { %v340_v16 = vld [vmem:[#allocation2 + $0x8] sm:$0xff] }
  0xe8   : > { %v316_v38 = vpop.xlane.xlu2 %315 }
  0xe9   : > { %v320_v39 = vadd.f32 %v316_v38, %v302_v37 }
  0xeb   : > { %322 = vst.msk [vmem:[#allocation4] sm:$0xff] %vm234_vm0, %v320_v39 }
  0xf2   : > { %v353_v2 = vld [vmem:[#allocation4] sm:$0xff] }
  0xf3   : > { %v355_v9 = vmul.f32 0.9, %v353_v2 }
  0xff   : > { %v276_v22 = vpop.permute.xlu1 %275 }
 0x100   : > { %v283_v23 = vsub.f32 %v243_v1, %v276_v22  ;;  %v339_v1 = vld [vmem:[#allocation2] sm:$0xff] }
 0x102   : > { %v285_v24 = vmul.f32 1.442695, %v283_v23 }
 0x104   : > { %760 = vpow2.f32 %v285_v24 }
 0x107   : > { %v281_v25 = vpop.permute.xlu1 %280 }
 0x108   : > { %v284_v26 = vsub.f32 %v244_v3, %v281_v25 }
 0x10a   : > { %v761_v27 = vpop.eup %760  ;;  %v287_v28 = vmul.f32 1.442695, %v284_v26 }
 0x10b   : > { %v289_v30 = vsel %vm252_vm1, %v761_v27, 0.0 }
 0x10c   : > { %762 = vpow2.f32 %v287_v28  ;;  %290 = vadd.xlane.f32.xlu0 %v289_v30 }
 0x10d   : > { %764 = vpow2.f32 %v267_v40 }
 0x10e   : > { %766 = vpow2.f32 %v269_v41 }
 0x112   : > { %v763_v32 = vpop.eup %762 }
 0x113   : > { %v292_v34 = vsel %vm252_vm1, %v763_v32, 0.0  ;;  %v765_v42 = vpop.eup %764 }
 0x114   : > { %318 = vadd.xlane.f32.xlu0 %v317_v33  ;;  %293 = vadd.xlane.f32.xlu1 %v292_v34  ;;  %v271_v44 = vmul.f32 %v765_v42, %v263_v43  ;;  %v767_v47 = vpop.eup %766 }
 0x115   : > { %v272_v50 = vmul.f32 %v767_v47, %v264_v48 }
 0x11c   : > { %327 = vadd.xlane.f32.xlu0 %v326_v35 }
 0x124   : > { %330 = vadd.xlane.f32.xlu0 %v329_v36 }
 0x17f   : > { %v291_v45 = vpop.xlane.xlu0 %290 }
 0x180   : > { %v295_v46 = vadd.f32 %v291_v45, %v271_v44 }
 0x182   : > { %298 = vst.msk [vmem:[#allocation3] sm:$0xff] %vm234_vm0, %v295_v46 }
 0x187   : > { %v294_v51 = vpop.xlane.xlu1 %293  ;;  %v319_v52 = vpop.xlane.xlu0 %318 }
 0x188   : > { %v296_v53 = vadd.f32 %v294_v51, %v272_v50  ;;  %v321_v54 = vadd.f32 %v319_v52, %v303_v49 }
 0x189   : > { %v341_v55 = vld [vmem:[#allocation3] sm:$0xff] }
 0x18a   : > { %299 = vst.msk [vmem:[#allocation3 + $0x8] sm:$0xff] %vm234_vm0, %v296_v53  ;;  %768 = vlog2.f32 %v341_v55 }
 0x18b   : > { %323 = vst.msk [vmem:[#allocation4 + $0x8] sm:$0xff] %vm234_vm0, %v321_v54 }
 0x18f   : > { %v328_v57 = vpop.xlane.xlu0 %327 }
 0x190   : > { %v332_v58 = vadd.f32 %v328_v57, %v324_v56  ;;  %v769_v59 = vpop.eup %768 }
 0x191   : > { %v342_v60 = vld [vmem:[#allocation3 + $0x8] sm:$0xff]  ;;  %v344_v61 = vmul.f32 0.6931472, %v769_v59 }
 0x192   : > { %334 = vst.msk [vmem:[#allocation5] sm:$0xff] %vm234_vm0, %v332_v58  ;;  %770 = vlog2.f32 %v342_v60  ;;  %v354_v17 = vld [vmem:[#allocation4 + $0x8] sm:$0xff] }
 0x193   : > { %v347_v4 = vadd.f32 %v344_v61, %v339_v1  ;;  %v356_v22 = vmul.f32 0.9, %v354_v17 }
 0x195   : > { %v357_v12 = vsub.f32 %v347_v4, %v355_v9 }
 0x197   : > { %v331_v3 = vpop.xlane.xlu0 %330 }
 0x198   : > { %v333_v5 = vadd.f32 %v331_v3, %v325_v63  ;;  %v771_v6 = vpop.eup %770 }
 0x199   : > { %v349_v8 = vld [vmem:[#allocation5] sm:$0xff]  ;;  %v346_v11 = vmul.f32 0.6931472, %v771_v6 }
 0x19a   : > { %v351_v10 = vmul.f32 0.01, %v349_v8  ;;  %335 = vst.msk [vmem:[#allocation5 + $0x8] sm:$0xff] %vm234_vm0, %v333_v5 }
 0x19b   : > { %v348_v18 = vadd.f32 %v346_v11, %v340_v16 }
 0x19c   : > { %v359_v13 = vmul.f32 0.1, %v351_v10 }
 0x19d   : > { %v358_v24 = vsub.f32 %v348_v18, %v356_v22 }
 0x19e   : > { %v361_v15 = vsub.f32 %v357_v12, %v359_v13 }
 0x1a0   : > { %v372_v19 = vsel %vm370_vm4, %v361_v15, 0.0 }
 0x1a1   : > { %374 = vst.msk [vmem:[%s978_s4] sm:$0xff] %vm234_vm0, %v372_v19  ;;  %v350_v21 = vld [vmem:[#allocation5 + $0x8] sm:$0xff] }
 0x1a2   : > { %v352_v23 = vmul.f32 0.01, %v350_v21 }
 0x1a4   : > { %v360_v25 = vmul.f32 0.1, %v352_v23 }
 0x1a5   : > { %382 = sbr.rel (!%p926_p3) target bundleno = 465 (0x1d1), region = 40 }
 0x1a6   : > { %v362_v26 = vsub.f32 %v358_v24, %v360_v25 }
 0x1a8   : > { %v373_v27 = vsel %vm371_vm5, %v362_v26, 0.0 }
 0x1a9   : > { %375 = vst.msk [vmem:[%s978_s4 + $0x8] sm:$0xff] %vm234_vm0, %v373_v27 }
 0x1aa   : > { %s1042_s5 = smov (!%p385_p9, %s384_s5), 2 }
 0x1ab   : > { %s632_s9 = sshll.u32 %s1042_s5, 3 }
 0x1ac   : > { %p635_p10 = scmp.eq.s32.totalorder %s632_s9, 0 }
 0x1ad   : > { %s998_s14 = sshrl.u32 (!%p635_p10), %s1042_s5, 1 }
 0x1ae   : > { %393 = sbr.rel (%p635_p10) target bundleno = 465 (0x1d1), region = 44  ;;  %p636_p11 = scmp.le.s32.totalorder (!%p635_p10), %s998_s14, 0 }
 0x1b3   : > { %561 = sbr.rel (%p636_p11) target bundleno = 448 (0x1c0), region = 123  ;;  %s844_s11 = smov (!%p636_p11), %s992_s8  }
 0x1b4   : > { %s848_s16 = smov (!%p636_p11), %s978_s4   ;;  %s852_s17 = smov (!%p636_p11), 0  }
 0x1b5   : > { %s856_s18 = smov (!%p636_p11), 0  }
 0x1b8 LB: >> { %v458_v28 = vld [vmem:[%s850_s16] sm:$0xff]  ;;  %v460_v29 = vld [vmem:[%s850_s16 + $0x8] sm:$0xff]  ;;  %s462_s20 = sadd.s32 1, %s854_s17  ;;  %s452_s18 = sadd.s32 1, %s858_s18   ;;  %s858_s18 = sphi %s856_s18, %s452_s18   ;;  %s854_s17 = sphi %s852_s17, %s853_s17   ;;  %s850_s16 = sphi %s848_s16, %s467_s16   ;;  %s846_s11 = sphi %s844_s11, %s468_s11  }
 0x1b9   : >> { %459 = vst [vmem:[%s846_s11] sm:$0xff] %v458_v28  ;;  %p463_p12 = scmp.ge.s32.totalorder %s462_s20, %s998_s14  ;;  %p451_p13 = scmp.ge.s32.totalorder %s452_s18, %s998_s14 }
 0x1ba   : >> { %461 = vst [vmem:[%s846_s11 + $0x8] sm:$0xff] %v460_v29 }
 0x1bb   : >> { %s1044_s20 = smov (%p463_p12, %s462_s20), 0  ;;  %454 = sbr.rel (!%p451_p13) target bundleno = 440 (0x1b8), region = 129 }
 0x1bc   : >> { %s637_s21 = sshll.u32 %s1044_s20, 4  ;;  %s853_s17 = smov %s1044_s20  }
 0x1bd   : >> { %s467_s16 = scalar_lea.vmem %s978_s4, %s637_s21 [#allocation6]   ;;  %s468_s11 = scalar_lea.vmem %s992_s8, %s637_s21  }
 0x1c0 PF: > { %s1008_s22 = sand.u32 1, %s1042_s5   ;;  %s648_s23 = sshll.u32 %s998_s14, 4 }
 0x1c1   : > { %s473_s24 = scalar_lea.vmem %s978_s4, %s648_s23 [#allocation6]   ;;  %s475_s25 = scalar_lea.vmem %s992_s8, %s648_s23  }
 0x1c2   : > { %p642_p0 = scmp.le.s32.totalorder %s1008_s22, 0 }
 0x1c3   : > { %s860_s26 = smov (!%p642_p0), %s475_s25   ;;  %s864_s27 = smov (!%p642_p0), %s473_s24  }
 0x1c4   : > { %575 = sbr.rel (%p642_p0) target bundleno = 465 (0x1d1), region = 134  ;;  %s868_s28 = smov (!%p642_p0), 0  }
 0x1c5   : > { %s872_s29 = smov (!%p642_p0), 0  }
 0x1c9 LB: >> { %v485_v30 = vld [vmem:[%s866_s27] sm:$0xff]  ;;  %s487_s30 = sadd.s32 1, %s870_s28  ;;  %s479_s29 = sadd.s32 1, %s874_s29   ;;  %s874_s29 = sphi %s872_s29, %s479_s29   ;;  %s870_s28 = sphi %s868_s28, %s869_s28   ;;  %s866_s27 = sphi %s864_s27, %s492_s27   ;;  %s862_s26 = sphi %s860_s26, %s493_s26  }
 0x1ca   : >> { %486 = vst [vmem:[%s862_s26] sm:$0xff] %v485_v30  ;;  %p488_p1 = scmp.ge.s32.totalorder %s487_s30, %s1008_s22  ;;  %p478_p2 = scmp.ge.s32.totalorder %s479_s29, %s1008_s22 }
 0x1cc   : >> { %s1046_s30 = smov (%p488_p1, %s487_s30), 0  ;;  %481 = sbr.rel (!%p478_p2) target bundleno = 457 (0x1c9), region = 140 }
 0x1cd   : >> { %s643_s3 = sshll.u32 %s1046_s30, 3  ;;  %s869_s28 = smov %s1046_s30  }
 0x1ce   : >> { %s492_s27 = scalar_lea.vmem %s473_s24, %s643_s3 [#allocation6]   ;;  %s493_s26 = scalar_lea.vmem %s475_s25, %s643_s3  }
 0x1d1 PF: > { %s12_s13 = sadd.s32 1, %s842_s13   ;;  %s1035_s9 = smov %s830_s10 }
 0x1d2   : > { %p9_p3 = scmp.ge.s32.totalorder %s12_s13, 6   ;;  %s1036_s10 = smov %s935_s19 }
 0x1d3   : > { %s1037_s11 = smov %s838_s12  ;;  %s1038_s12 = smov %s1040_s15 }
 0x1d4   :  { %11 = sbr.rel (!%p9_p3) target bundleno = 3 (0x3), region = 151 }

</bundles_post_ra>
